<compile_context>
chip_gen: v5e
topology: v5e:2x2
jax: 0.10.0
libtpu: 0.0.40
codegen_flags: <defaults>
</compile_context>

<pallas_src>
import math
import jax
import jax.numpy as jnp
from jax.experimental import pallas as pl
from jax.experimental.pallas import tpu as pltpu

_LANE = 128
_SUBLANE = 8


def _rup(n, m):
    return ((n + m - 1) // m) * m


# ----------------------------------------------------------------------------
# Pallas kernel: fused 3-conv masked classification head for one segment
# ----------------------------------------------------------------------------
def _cls_head_kernel(x_ref, m_ref,
                     w1_ref, b1_ref,
                     w2_ref, b2_ref,
                     w3_ref, b3_ref,
                     o_ref):
    T = x_ref.shape[1]
    x = x_ref[0].astype(jnp.float32)            # (T, Cin_p) f32
    mask = m_ref[0]                              # (T, 1)     f32

    def conv_cat(h):
        # im2col operand [h[t-1], h[t], h[t+1]] built with XLU rolls.
        # The wrapper guarantees row T-1 is a padded row (zero input, mask=0),
        # so the wrapped value at row 0 is already 0 (== zero 'same' padding),
        # and the wrapped value at row T-1 only pollutes a row whose output is
        # zeroed by the mask.  No boundary fixup needed.
        prev = pltpu.roll(h, shift=1, axis=0)
        nxt = pltpu.roll(h, shift=T - 1, axis=0)
        return jnp.concatenate(
            [prev.astype(jnp.bfloat16),
             h.astype(jnp.bfloat16),
             nxt.astype(jnp.bfloat16)], axis=-1)          # (T, 3*C) bf16

    def layer(h, w_ref, b_ref, relu):
        # Single bf16 MXU matmul with f32 accumulation; bias + mask epilogue.
        y = jnp.dot(conv_cat(h), w_ref[...],
                    preferred_element_type=jnp.float32)
        y = (y + b_ref[0]) * mask                # MaskedConv1D: mask AFTER conv
        return jnp.maximum(y, 0.0) if relu else y

    h = layer(x, w1_ref, b1_ref, relu=True)      # conv1 -> mask -> ReLU
    h = layer(h, w2_ref, b2_ref, relu=True)      # conv2 -> mask -> ReLU
    o_ref[0] = layer(h, w3_ref, b3_ref, relu=False).astype(o_ref.dtype)  # cls


# ----------------------------------------------------------------------------
# Wrapper: pack/pad params, stack all (level, batch) segments, one pallas_call
# ----------------------------------------------------------------------------
def _pack_conv_weight(w, cin_p, cout_p):
    """(K, Cin, Cout) -> zero-padded, flattened (K*Cin_p, Cout_p) bf16."""
    K, cin, cout = w.shape
    wp = jnp.pad(w, ((0, 0), (0, cin_p - cin), (0, cout_p - cout)))
    return wp.reshape(K * cin_p, cout_p).astype(jnp.bfloat16)


def _pack_bias(b, cout_p):
    return jnp.pad(b, ((0, 0), (0, cout_p - b.shape[1]))).astype(jnp.float32)


def ccnet_cls_head_forward(fpn_feats, fpn_masks, params):
    """fpn_feats: list of (B, T_l, Cin) arrays; fpn_masks: list of (B, T_l, 1) bool.

    Returns a tuple of (B, T_l, num_classes) float32 logits, one per level.
    """
    assert len(fpn_feats) == len(fpn_masks)
    w1, b1, w2, b2, w3, b3 = params
    K, Cin, Cf = w1.shape
    Cn = w3.shape[2]
    assert K == 3, "kernel is specialized for kernel_size=3 (padding=1)"

    Cin_p = _rup(Cin, _LANE)
    Cf_p = _rup(Cf, _LANE)
    Cn_p = _rup(Cn, _LANE)

    w1p = _pack_conv_weight(w1, Cin_p, Cf_p)
    w2p = _pack_conv_weight(w2, Cf_p, Cf_p)
    w3p = _pack_conv_weight(w3, Cf_p, Cn_p)
    b1p = _pack_bias(b1, Cf_p)
    b2p = _pack_bias(b2, Cf_p)
    b3p = _pack_bias(b3, Cn_p)

    lens = [f.shape[1] for f in fpn_feats]
    B = fpn_feats[0].shape[0]
    # Always keep >=1 zero-input / zero-mask trailing row so the in-kernel
    # roll wrap-around exactly reproduces the conv's zero 'same' padding.
    Tp = _rup(max(lens) + 1, _SUBLANE)
    assert Tp > max(lens)

    xs, ms = [], []
    for feat, mask in zip(fpn_feats, fpn_masks):
        T = feat.shape[1]
        xs.append(jnp.pad(feat, ((0, 0), (0, Tp - T), (0, Cin_p - Cin)))
                  .astype(jnp.bfloat16))
        ms.append(jnp.pad(mask.astype(jnp.float32),
                          ((0, 0), (0, Tp - T), (0, 0))))
    x_all = jnp.concatenate(xs, axis=0)        # (L*B, Tp, Cin_p) bf16
    m_all = jnp.concatenate(ms, axis=0)        # (L*B, Tp, 1)     f32
    S = x_all.shape[0]

    out_all = pl.pallas_call(
        _cls_head_kernel,
        out_shape=jax.ShapeDtypeStruct((S, Tp, Cn_p), jnp.float32),
        grid_spec=pltpu.PrefetchScalarGridSpec(
            num_scalar_prefetch=0,
            grid=(S,),
            in_specs=[
                pl.BlockSpec((1, Tp, Cin_p), lambda s: (s, 0, 0)),
                pl.BlockSpec((1, Tp, 1),     lambda s: (s, 0, 0)),
                # Constant index maps: weights/biases are fetched once and stay
                # resident in VMEM across all segments/levels.
                pl.BlockSpec((3 * Cin_p, Cf_p), lambda s: (0, 0)),
                pl.BlockSpec((1, Cf_p),         lambda s: (0, 0)),
                pl.BlockSpec((3 * Cf_p, Cf_p),  lambda s: (0, 0)),
                pl.BlockSpec((1, Cf_p),         lambda s: (0, 0)),
                pl.BlockSpec((3 * Cf_p, Cn_p),  lambda s: (0, 0)),
                pl.BlockSpec((1, Cn_p),         lambda s: (0, 0)),
            ],
            out_specs=pl.BlockSpec((1, Tp, Cn_p), lambda s: (s, 0, 0)),
        ),
        compiler_params=pltpu.CompilerParams(
            dimension_semantics=("parallel",)),
    )(x_all, m_all, w1p, b1p, w2p, b2p, w3p, b3p)

    outs = ()
    for l, T in enumerate(lens):
        outs += (out_all[l * B:(l + 1) * B, :T, :Cn],)
    return outs


# ----------------------------------------------------------------------------
# Parameter init (matches CCNet_ClsHead init semantics; layout (K, Cin, Cout))
# ----------------------------------------------------------------------------
def init_params(key, input_dim, feat_dim, num_classes, kernel_size=3,
                prior_prob=0.01, empty_cls=()):
    k1, k2, k3 = jax.random.split(key, 3)
    std = 0.02
    w1 = std * jax.random.normal(k1, (kernel_size, input_dim, feat_dim), jnp.float32)
    w2 = std * jax.random.normal(k2, (kernel_size, feat_dim, feat_dim), jnp.float32)
    w3 = std * jax.random.normal(k3, (kernel_size, feat_dim, num_classes), jnp.float32)
    b1 = jnp.zeros((1, feat_dim), jnp.float32)
    b2 = jnp.zeros((1, feat_dim), jnp.float32)
    bias_value = -math.log((1 - prior_prob) / prior_prob)
    b3 = jnp.full((1, num_classes), bias_value, jnp.float32)
    if len(empty_cls) > 0:
        empty_bias = -math.log((1 - 1e-06) / 1e-06)
        b3 = b3.at[0, jnp.array(list(empty_cls))].set(empty_bias)
    return (w1, b1, w2, b2, w3, b3)


# ----------------------------------------------------------------------------
# Pure-JAX f32 reference (module semantics) for correctness checking
# ----------------------------------------------------------------------------
def _ref_masked_conv(x, mask_f, w, b):
    K = w.shape[0]
    pad = K // 2
    T = x.shape[1]
    xp = jnp.pad(x, ((0, 0), (pad, pad), (0, 0)))
    acc = sum(jnp.einsum('btc,cd->btd', xp[:, k:k + T, :], w[k]) for k in range(K))
    return (acc + b[0]) * mask_f


def ref_forward(fpn_feats, fpn_masks, params):
    w1, b1, w2, b2, w3, b3 = params
    outs = ()
    for x, mask in zip(fpn_feats, fpn_masks):
        m = mask.astype(jnp.float32)
        h = jnp.maximum(_ref_masked_conv(x, m, w1, b1), 0.0)
        h = jnp.maximum(_ref_masked_conv(h, m, w2, b2), 0.0)
        outs += (_ref_masked_conv(h, m, w3, b3),)
    return outs


if __name__ == "__main__":
    B = 2
    input_dim = 32
    feat_dim = 32
    num_classes = 8
    level_lens = (16, 8)

    key = jax.random.PRNGKey(0)
    kx, kp = jax.random.split(key)
    params = init_params(kp, input_dim, feat_dim, num_classes)

    fpn_feats = []
    fpn_masks = []
    for i, T in enumerate(level_lens):
        kx, kf = jax.random.split(kx)
        fpn_feats.append(jax.random.normal(kf, (B, T, input_dim), jnp.float32))
        # valid-length mask: first 3/4 of the sequence is valid
        valid = (jnp.arange(T)[None, :, None] < (3 * T // 4))
        fpn_masks.append(jnp.broadcast_to(valid, (B, T, 1)))

    outs = ccnet_cls_head_forward(fpn_feats, fpn_masks, params)
    outs = jax.block_until_ready(outs)

    refs = ref_forward(fpn_feats, fpn_masks, params)
    for o, r in zip(outs, refs):
        assert o.shape == r.shape
        # bf16 MXU operands (f32 accumulation) => re-baselined tolerance vs the
        # pure-f32 reference.
        assert jnp.allclose(o, r, atol=1e-2, rtol=1e-2), "mismatch vs reference"

    print("KERNEL_OK")
</pallas_src>

<mosaic_0001>
module attributes {stable_mosaic.version = 11 : i64} {
  func.func @_cls_head_kernel(%arg0: i32, %arg1: memref<1x24x128xbf16, #tpu.memory_space<vmem>>, %arg2: memref<1x24x1xf32, #tpu.memory_space<vmem>>, %arg3: memref<384x128xbf16, #tpu.memory_space<vmem>>, %arg4: memref<1x128xf32, #tpu.memory_space<vmem>>, %arg5: memref<384x128xbf16, #tpu.memory_space<vmem>>, %arg6: memref<1x128xf32, #tpu.memory_space<vmem>>, %arg7: memref<384x128xbf16, #tpu.memory_space<vmem>>, %arg8: memref<1x128xf32, #tpu.memory_space<vmem>>, %arg9: memref<1x24x128xf32, #tpu.memory_space<vmem>>) attributes {dimension_semantics = [#tpu.dimension_semantics<parallel>], iteration_bounds = array<i64: 4>, scalar_prefetch = 0 : i64, scratch_operands = 0 : i64, tpu.core_type = #tpu.core_type<tc>, window_params = [{transform_indices = @transform_0, window_bounds = array<i64: 1, 24, 128>}, {transform_indices = @transform_1, window_bounds = array<i64: 1, 24, 1>}, {pipeline_mode = #tpu.pipeline_mode<synchronous>, transform_indices = @transform_2, window_bounds = array<i64: 384, 128>}, {pipeline_mode = #tpu.pipeline_mode<synchronous>, transform_indices = @transform_3, window_bounds = array<i64: 1, 128>}, {pipeline_mode = #tpu.pipeline_mode<synchronous>, transform_indices = @transform_4, window_bounds = array<i64: 384, 128>}, {pipeline_mode = #tpu.pipeline_mode<synchronous>, transform_indices = @transform_5, window_bounds = array<i64: 1, 128>}, {pipeline_mode = #tpu.pipeline_mode<synchronous>, transform_indices = @transform_6, window_bounds = array<i64: 384, 128>}, {pipeline_mode = #tpu.pipeline_mode<synchronous>, transform_indices = @transform_7, window_bounds = array<i64: 1, 128>}, {transform_indices = @transform_8, window_bounds = array<i64: 1, 24, 128>}]} {
    %c0 = arith.constant 0 : index
    %c0_0 = arith.constant 0 : index
    %c0_1 = arith.constant 0 : index
    %0 = vector.load %arg1[%c0, %c0_0, %c0_1] : memref<1x24x128xbf16, #tpu.memory_space<vmem>>, vector<1x24x128xbf16>
    %1 = vector.shape_cast %0 : vector<1x24x128xbf16> to vector<24x128xbf16>
    %2 = arith.extf %1 : vector<24x128xbf16> to vector<24x128xf32>
    %c0_2 = arith.constant 0 : index
    %c0_3 = arith.constant 0 : index
    %c0_4 = arith.constant 0 : index
    %3 = vector.load %arg2[%c0_2, %c0_3, %c0_4] : memref<1x24x1xf32, #tpu.memory_space<vmem>>, vector<1x24x1xf32>
    %4 = vector.shape_cast %3 : vector<1x24x1xf32> to vector<24x1xf32>
    %c1_i32 = arith.constant 1 : i32
    %5 = tpu.dynamic_rotate %2 by %c1_i32 dim 0 : vector<24x128xf32>, i32 -> vector<24x128xf32>
    %c23_i32 = arith.constant 23 : i32
    %6 = tpu.dynamic_rotate %2 by %c23_i32 dim 0 : vector<24x128xf32>, i32 -> vector<24x128xf32>
    %7 = arith.truncf %5 : vector<24x128xf32> to vector<24x128xbf16>
    %8 = arith.truncf %2 : vector<24x128xf32> to vector<24x128xbf16>
    %9 = arith.truncf %6 : vector<24x128xf32> to vector<24x128xbf16>
    %10 = tpu.concatenate %7, %8, %9 in 1 : vector<24x128xbf16>, vector<24x128xbf16>, vector<24x128xbf16> -> vector<24x384xbf16>
    %c0_5 = arith.constant 0 : index
    %c0_6 = arith.constant 0 : index
    %11 = vector.load %arg3[%c0_5, %c0_6] : memref<384x128xbf16, #tpu.memory_space<vmem>>, vector<384x128xbf16>
    %cst = arith.constant dense<0.000000e+00> : vector<24x128xf32>
    %12 = tpu.matmul %10, %11, %cst {dimension_numbers = #tpu.dot_dimension_numbers<[1], [0], [0], [1], [0, 0, 1, 1], [], []>} : vector<24x384xbf16>, vector<384x128xbf16>, vector<24x128xf32> -> vector<24x128xf32>
    %c0_7 = arith.constant 0 : index
    %c0_8 = arith.constant 0 : index
    %13 = vector.load %arg4[%c0_7, %c0_8] : memref<1x128xf32, #tpu.memory_space<vmem>>, vector<1x128xf32>
    %14 = vector.shape_cast %13 : vector<1x128xf32> to vector<128xf32>
    %15 = vector.shape_cast %14 : vector<128xf32> to vector<1x128xf32>
    %16 = vector.broadcast %15 : vector<1x128xf32> to vector<24x128xf32>
    %17 = arith.addf %12, %16 : vector<24x128xf32>
    %18 = vector.broadcast %4 : vector<24x1xf32> to vector<24x128xf32>
    %19 = arith.mulf %17, %18 : vector<24x128xf32>
    %cst_9 = arith.constant 0.000000e+00 : f32
    %20 = vector.broadcast %cst_9 : f32 to vector<24x128xf32>
    %21 = arith.maximumf %19, %20 : vector<24x128xf32>
    %c1_i32_10 = arith.constant 1 : i32
    %22 = tpu.dynamic_rotate %21 by %c1_i32_10 dim 0 : vector<24x128xf32>, i32 -> vector<24x128xf32>
    %c23_i32_11 = arith.constant 23 : i32
    %23 = tpu.dynamic_rotate %21 by %c23_i32_11 dim 0 : vector<24x128xf32>, i32 -> vector<24x128xf32>
    %24 = arith.truncf %22 : vector<24x128xf32> to vector<24x128xbf16>
    %25 = arith.truncf %21 : vector<24x128xf32> to vector<24x128xbf16>
    %26 = arith.truncf %23 : vector<24x128xf32> to vector<24x128xbf16>
    %27 = tpu.concatenate %24, %25, %26 in 1 : vector<24x128xbf16>, vector<24x128xbf16>, vector<24x128xbf16> -> vector<24x384xbf16>
    %c0_12 = arith.constant 0 : index
    %c0_13 = arith.constant 0 : index
    %28 = vector.load %arg5[%c0_12, %c0_13] : memref<384x128xbf16, #tpu.memory_space<vmem>>, vector<384x128xbf16>
    %cst_14 = arith.constant dense<0.000000e+00> : vector<24x128xf32>
    %29 = tpu.matmul %27, %28, %cst_14 {dimension_numbers = #tpu.dot_dimension_numbers<[1], [0], [0], [1], [0, 0, 1, 1], [], []>} : vector<24x384xbf16>, vector<384x128xbf16>, vector<24x128xf32> -> vector<24x128xf32>
    %c0_15 = arith.constant 0 : index
    %c0_16 = arith.constant 0 : index
    %30 = vector.load %arg6[%c0_15, %c0_16] : memref<1x128xf32, #tpu.memory_space<vmem>>, vector<1x128xf32>
    %31 = vector.shape_cast %30 : vector<1x128xf32> to vector<128xf32>
    %32 = vector.shape_cast %31 : vector<128xf32> to vector<1x128xf32>
    %33 = vector.broadcast %32 : vector<1x128xf32> to vector<24x128xf32>
    %34 = arith.addf %29, %33 : vector<24x128xf32>
    %35 = vector.broadcast %4 : vector<24x1xf32> to vector<24x128xf32>
    %36 = arith.mulf %34, %35 : vector<24x128xf32>
    %cst_17 = arith.constant 0.000000e+00 : f32
    %37 = vector.broadcast %cst_17 : f32 to vector<24x128xf32>
    %38 = arith.maximumf %36, %37 : vector<24x128xf32>
    %c1_i32_18 = arith.constant 1 : i32
    %39 = tpu.dynamic_rotate %38 by %c1_i32_18 dim 0 : vector<24x128xf32>, i32 -> vector<24x128xf32>
    %c23_i32_19 = arith.constant 23 : i32
    %40 = tpu.dynamic_rotate %38 by %c23_i32_19 dim 0 : vector<24x128xf32>, i32 -> vector<24x128xf32>
    %41 = arith.truncf %39 : vector<24x128xf32> to vector<24x128xbf16>
    %42 = arith.truncf %38 : vector<24x128xf32> to vector<24x128xbf16>
    %43 = arith.truncf %40 : vector<24x128xf32> to vector<24x128xbf16>
    %44 = tpu.concatenate %41, %42, %43 in 1 : vector<24x128xbf16>, vector<24x128xbf16>, vector<24x128xbf16> -> vector<24x384xbf16>
    %c0_20 = arith.constant 0 : index
    %c0_21 = arith.constant 0 : index
    %45 = vector.load %arg7[%c0_20, %c0_21] : memref<384x128xbf16, #tpu.memory_space<vmem>>, vector<384x128xbf16>
    %cst_22 = arith.constant dense<0.000000e+00> : vector<24x128xf32>
    %46 = tpu.matmul %44, %45, %cst_22 {dimension_numbers = #tpu.dot_dimension_numbers<[1], [0], [0], [1], [0, 0, 1, 1], [], []>} : vector<24x384xbf16>, vector<384x128xbf16>, vector<24x128xf32> -> vector<24x128xf32>
    %c0_23 = arith.constant 0 : index
    %c0_24 = arith.constant 0 : index
    %47 = vector.load %arg8[%c0_23, %c0_24] : memref<1x128xf32, #tpu.memory_space<vmem>>, vector<1x128xf32>
    %48 = vector.shape_cast %47 : vector<1x128xf32> to vector<128xf32>
    %49 = vector.shape_cast %48 : vector<128xf32> to vector<1x128xf32>
    %50 = vector.broadcast %49 : vector<1x128xf32> to vector<24x128xf32>
    %51 = arith.addf %46, %50 : vector<24x128xf32>
    %52 = vector.broadcast %4 : vector<24x1xf32> to vector<24x128xf32>
    %53 = arith.mulf %51, %52 : vector<24x128xf32>
    %c0_25 = arith.constant 0 : index
    %c0_26 = arith.constant 0 : index
    %c0_27 = arith.constant 0 : index
    %54 = vector.load %arg9[%c0_25, %c0_26, %c0_27] : memref<1x24x128xf32, #tpu.memory_space<vmem>>, vector<1x24x128xf32>
    %55 = vector.shape_cast %54 : vector<1x24x128xf32> to vector<24x128xf32>
    %56 = vector.shape_cast %53 : vector<24x128xf32> to vector<1x24x128xf32>
    tpu.vector_store %arg9[%c0_25, %c0_26, %c0_27], %56 {strides = array<i32>} : memref<1x24x128xf32, #tpu.memory_space<vmem>>, vector<1x24x128xf32>,
    return
  }
  func.func @transform_0(%arg0: i32) -> (i32, i32, i32) {
    %c0_i32 = arith.constant 0 : i32
    %c0_i32_0 = arith.constant 0 : i32
    %c0_i32_1 = arith.constant 0 : i32
    return %arg0, %c0_i32, %c0_i32_0 : i32, i32, i32
  }
  func.func @transform_1(%arg0: i32) -> (i32, i32, i32) {
    %c0_i32 = arith.constant 0 : i32
    %c0_i32_0 = arith.constant 0 : i32
    %c0_i32_1 = arith.constant 0 : i32
    return %arg0, %c0_i32, %c0_i32_0 : i32, i32, i32
  }
  func.func @transform_2(%arg0: i32) -> (i32, i32) {
    %c0_i32 = arith.constant 0 : i32
    %c0_i32_0 = arith.constant 0 : i32
    %c0_i32_1 = arith.constant 0 : i32
    return %c0_i32, %c0_i32_0 : i32, i32
  }
  func.func @transform_3(%arg0: i32) -> (i32, i32) {
    %c0_i32 = arith.constant 0 : i32
    %c0_i32_0 = arith.constant 0 : i32
    %c0_i32_1 = arith.constant 0 : i32
    return %c0_i32, %c0_i32_0 : i32, i32
  }
  func.func @transform_4(%arg0: i32) -> (i32, i32) {
    %c0_i32 = arith.constant 0 : i32
    %c0_i32_0 = arith.constant 0 : i32
    %c0_i32_1 = arith.constant 0 : i32
    return %c0_i32, %c0_i32_0 : i32, i32
  }
  func.func @transform_5(%arg0: i32) -> (i32, i32) {
    %c0_i32 = arith.constant 0 : i32
    %c0_i32_0 = arith.constant 0 : i32
    %c0_i32_1 = arith.constant 0 : i32
    return %c0_i32, %c0_i32_0 : i32, i32
  }
  func.func @transform_6(%arg0: i32) -> (i32, i32) {
    %c0_i32 = arith.constant 0 : i32
    %c0_i32_0 = arith.constant 0 : i32
    %c0_i32_1 = arith.constant 0 : i32
    return %c0_i32, %c0_i32_0 : i32, i32
  }
  func.func @transform_7(%arg0: i32) -> (i32, i32) {
    %c0_i32 = arith.constant 0 : i32
    %c0_i32_0 = arith.constant 0 : i32
    %c0_i32_1 = arith.constant 0 : i32
    return %c0_i32, %c0_i32_0 : i32, i32
  }
  func.func @transform_8(%arg0: i32) -> (i32, i32, i32) {
    %c0_i32 = arith.constant 0 : i32
    %c0_i32_0 = arith.constant 0 : i32
    %c0_i32_1 = arith.constant 0 : i32
    return %arg0, %c0_i32, %c0_i32_0 : i32, i32, i32
  }
}

</mosaic_0001>

<bundles_post_ra>
// kernel: tpu_custom_call.1
= control target key start
LH: loop header
LB: loop body
LE: loop exit
PB: predicated region body
PF: predicated region fallthrough
CT: control target
= control target key end

     0   :  { %s2340_s0 = inlined_call_operand.vmem [shape: bf16[4,24,128], index: 0, kind: input, shape index: {}]   ;;  %s2341_s1 = inlined_call_operand.vmem [shape: f32[4,24,1], index: 1, kind: input, shape index: {}]   ;;  %s2342_s2 = inlined_call_operand.hbm [shape: bf16[384,128], index: 2, kind: input, shape index: {}]   ;;  %s2343_s3 = inlined_call_operand.vmem [shape: f32[1,128], index: 3, kind: input, shape index: {}]   ;;  %s2344_s4 = inlined_call_operand.hbm [shape: bf16[384,128], index: 4, kind: input, shape index: {}]   ;;  %s2345_s5 = inlined_call_operand.vmem [shape: f32[1,128], index: 5, kind: input, shape index: {}]   ;;  %s2346_s6 = inlined_call_operand.hbm [shape: bf16[384,128], index: 6, kind: input, shape index: {}]   ;;  %s2347_s7 = inlined_call_operand.vmem [shape: f32[1,128], index: 7, kind: input, shape index: {}]   ;;  %s2348_s8 = inlined_call_operand.hbm [shape: f32[4,24,128], index: 8, kind: output, shape index: {}]  }
   0x1   :  { %2349 = sst [smem:[#allocation12_spill]] %s2342_s2 }
   0x2   :  { %2350 = sst [smem:[#allocation13_spill]] %s2344_s4 }
   0x3   :  { %13 = vsyncpa [#allocation3], 0 }
   0x4   :  { %14 = vsyncpa [#allocation6], 0 }
   0x5   :  { %15 = vsyncpa [#allocation4], 0 }
   0x6   :  { %17 = vsyncpa [#allocation4 + $0x1], 0  ;;  %s2128_s27 = smov 0   ;;  %s2130_s28 = smov 0  }
   0x7   :  { %s2132_s29 = smov 0   ;;  %s2134_s30 = smov 0  }
   0x8 LB: > { %s2149_s9 = sadd.s32 4294967295, %s2073_s30   ;;  %s1441_s10 = sadd.s32 4294967294, %s2073_s30   ;;  %s2073_s30 = sphi %s2134_s30, %s2360_s30   ;;  %s2069_s29 = sphi %s2132_s29, %s2359_s29   ;;  %s2065_s28 = sphi %s2130_s28, %s2358_s28   ;;  %s2061_s27 = sphi %s2128_s27, %s2357_s27  }
   0x9   : > { %s2153_s11 = sadd.s32 1, %s2073_s30   ;;  %s208_s12 = sadd.s32 1, %s2069_s29 }
   0xa   : > { %s205_s13 = ssub.s32 %s2073_s30, %s2153_s11  ;;  %p218_p0 = scmp.ne.s32.totalorder %s2069_s29, %s2065_s28 }
   0xb   : > { %p206_p1 = scmp.eq.s32.totalorder %s205_s13, 0  ;;  %p219_p2 = scmp.eq.s32.totalorder %s2149_s9, 3 }
   0xc   : > { %p224_p3 = scmp.ne.s32.totalorder %s2065_s28, %s2061_s27  ;;  %p225_p4 = scmp.eq.s32.totalorder %s1441_s10, 3 }
   0xd   : > { %s2164_s14 = scalar_select %p206_p1, %s2069_s29, %s208_s12  }
   0xe   : > { %p2166_p5 = por %p219_p2, %p218_p0  ;;  %p2170_p6 = por %p225_p4, %p224_p3 }
   0xf   : > { %p1442_p7 = scmp.ge.s32.totalorder %s2073_s30, 1  ;;  %p232_p8 = scmp.lt.s32.totalorder %s2073_s30, 5 }
  0x10   : > { %p1861_p9 = scmp.eq.s32.totalorder %s2149_s9, 0  ;;  %s2354_s4 = sld [smem:[#allocation13_spill]] }
  0x11   : > { %p2177_p10 = pnand %p1442_p7, %p232_p8  ;;  %s2355_s2 = sld [smem:[#allocation12_spill]] }
  0x12   : > { %s2075_s25 = smov [#allocation5]   ;;  %s2076_s10 = smov 64  }
  0x13   : > { %p1847_p11 = pneg %p2177_p10  ;;  %s262_s26 = sshll.u32 %s2075_s25, 4  ;;  %s263_s26 = int_to_ptr.vmem [resolvable:$true] %s262_s26 }
  0x14   : > { %s2077_s12 = smov 4   ;;  %s2078_s13 = smov [#allocation2]  }
  0x15   : > { %p2191_p12 = pnand %p1861_p9, %p1847_p11  ;;  %s245_s18 = sshll.u32 %s2078_s13, 4  ;;  %s246_s18 = int_to_ptr.vmem [resolvable:$true] %s245_s18 }
  0x16   : > { %s260_s20 = sshll.u32 %s2354_s4, 4  ;;  %s277_s22 = sshll.u32 %s2346_s6, 4  ;;  %s261_s20 = int_to_ptr.hbm [resolvable:$true] %s260_s20  ;;  %s278_s22 = int_to_ptr.hbm [resolvable:$true] %s277_s22 }
  0x17   : > { %s243_s23 = sshll.u32 %s2355_s2, 4  ;;  %s2079_s2 = smov [#allocation7]   ;;  %s244_s23 = int_to_ptr.hbm [resolvable:$true] %s243_s23 }
  0x18   : > { %1853 = dma.hbm_to_vmem [thread:$0]  (!%p2191_p12), %s261_s20, 3072, %s263_s26, [#allocation6], %s2076_s10, %s2076_s10, %s2077_s12  }
  0x19   : > { %1850 = dma.hbm_to_vmem [thread:$0]  (!%p2191_p12), %s244_s23, 3072, %s246_s18, [#allocation3], %s2076_s10, %s2076_s10, %s2077_s12  }
  0x1a   : > { %s279_s4 = sshll.u32 %s2079_s2, 4  ;;  %314 = sbr.rel (%p2177_p10) target bundleno = 558 (0x22e), region = 52  ;;  %s280_s4 = int_to_ptr.vmem [resolvable:$true] %s279_s4 }
  0x1b   : > { %1856 = dma.hbm_to_vmem [thread:$0]  (!%p2191_p12), %s278_s22, 3072, %s280_s4, [#allocation6], %s2076_s10, %s2076_s10, %s2077_s12  }
  0x1f   : > { %2048 = dma.done.wait (%p1861_p9), [#allocation3], 3072  }
  0x20   : > { %2050 = vsyncadd (%p1861_p9), [#allocation3], 4294964224 }
  0x21   : > { %2052 = dma.done.wait (%p1861_p9), [#allocation6], 6144  }
  0x22   : > { %2054 = vsyncadd (%p1861_p9), [#allocation6], 4294961152  ;;  %p364_p13 = scmp.lt.s32.totalorder %s2149_s9, 3  ;;  %v1756_v0 = vld [vmem:[#allocation2 + $0x38] sm:$0xff]  ;;  %v1755_v3 = vld [vmem:[#allocation2 + $0x30] sm:$0xff]  ;;  %v386_v9 = vlaneseq  ;;  %v2080_v37 = vmov 0  }
  0x23   : > { %v1764_v1 = vld [vmem:[#allocation2 + $0x78] sm:$0xff]  ;;  %631 = vmatpush.bf16.msra.mxu0 %v1756_v0  ;;  %v1763_v4 = vld [vmem:[#allocation2 + $0x70] sm:$0xff]  ;;  %v1754_v6 = vld [vmem:[#allocation2 + $0x28] sm:$0xff]  ;;  %1908 = vset.pattern.permute.xlu0 %v2080_v37  ;;  %s1832_s20 = smul.u32 24, %s2149_s9  ;;  %s2023_s21 = scalar_lea.hbm %s2348_s8, 96 }
  0x24   : > { %s2216_s2 = scalar_select %p364_p13, %s2149_s9, 3  ;;  %v1772_v2 = vld [vmem:[#allocation2 + $0xb8] sm:$0xff]  ;;  %649 = vmatpush.bf16.msra.mxu1 %v1764_v1  ;;  %v1771_v5 = vld [vmem:[#allocation2 + $0xb0] sm:$0xff]  ;;  %v1762_v7 = vld [vmem:[#allocation2 + $0x68] sm:$0xff]  ;;  %v2229_v18 = vshrl.u32 %v386_v9, 7  ;;  %1909 = vset.pattern.permute.xlu1 %v2080_v37 }
  0x25   : > { %667 = vmatpush.bf16.msra.mxu2 %v1772_v2  ;;  %v1770_v8 = vld [vmem:[#allocation2 + $0xa8] sm:$0xff]  ;;  %v1753_v12 = vld [vmem:[#allocation2 + $0x20] sm:$0xff]  ;;  %v1752_v19 = vld [vmem:[#allocation2 + $0x18] sm:$0xff]  ;;  %s1332_s25 = scalar_lea.hbm %s2348_s8, %s1832_s20 }
  0x26   : > { %s1830_s4 = smul.u32 12, %s2216_s2  ;;  %v1761_v13 = vld [vmem:[#allocation2 + $0x60] sm:$0xff]  ;;  %v1760_v20 = vld [vmem:[#allocation2 + $0x58] sm:$0xff]  ;;  %vm388_vm0 = vcmp.lt.s32.totalorder %v2229_v18, 1  ;;  %vm395_vm1 = vcmp.lt.s32.totalorder %v2229_v18, 7  ;;  %v1751_v28 = vld [vmem:[#allocation2 + $0x10] sm:$0xff] }
  0x27   : > { %632 = vmatpush.bf16.msra.mxu0 %v1755_v3  ;;  %v1769_v17 = vld [vmem:[#allocation2 + $0xa0] sm:$0xff]  ;;  %s1831_s24 = smul.u32 24, %s2216_s2  ;;  %v1768_v24 = vld [vmem:[#allocation2 + $0x98] sm:$0xff]  ;;  %v1759_v29 = vld [vmem:[#allocation2 + $0x50] sm:$0xff]  ;;  %s361_s2 = sand.u32 1, %s2065_s28  }
  0x28   : > { %s2222_s23 = scalar_lea.vmem %s2340_s0, %s1830_s4  ;;  %650 = vmatpush.bf16.msra.mxu1 %v1763_v4  ;;  %v1767_v34 = vld [vmem:[#allocation2 + $0x90] sm:$0xff]  ;;  %v1750_v40 = vld [vmem:[#allocation2 + $0x8] sm:$0xff]  ;;  %v1749_v48 = vld [vmem:[#allocation2] sm:$0xff]  ;;  %s1829_s4 = smul.u32 24, %s361_s2 }
  0x29   : > { %668 = vmatpush.bf16.msra.mxu2 %v1771_v5  ;;  %v374_v10 = vld [vmem:[%s2222_s23] sm:$0xff]   ;;  %v2226_v11 = vld [vmem:[%s2222_s23 + $0x8] sm:$0xf]  ;;  %s2236_s10 = scalar_lea.vmem %s2341_s1, %s1831_s24  ;;  %v1788_v53 = vld [vmem:[#allocation5 + $0x78] sm:$0xff]  ;;  %s1321_s9 = scalar_lea.sflag [#allocation4], %s361_s2 }
  0x2a   : > { %v377_v14 = vunpack.c.l.bf16 %v374_v10  ;;  %v378_v15 = vunpack.c.h.bf16 %v374_v10  ;;  %v379_v16 = vunpack.c.l.bf16 %v2226_v11  ;;  %v380_v32 = vld [vmem:[%s2236_s10] sm:$0xff]  ;;  %v382_v33 = vld [vmem:[%s2236_s10 + $0x10] sm:$0xff]  ;;  %v1758_v41 = vld [vmem:[#allocation2 + $0x48] sm:$0xff]  ;;  %v420_v62 = vunpack.c.l.b16 %v2226_v11  ;;  %s363_s17 = scalar_lea.vmem [#allocation8], %s1829_s4 }
  0x2b   : > { %633 = vmatpush.bf16.msra.mxu0 %v1754_v6  ;;  %687 = vperm.xlu0 %1908, %v380_v32   ;;  %v1766_v44 = vld [vmem:[#allocation2 + $0x88] sm:$0xff]  ;;  %v1757_v49 = vld [vmem:[#allocation2 + $0x40] sm:$0xff]  ;;  %v1787_v3 = vld [vmem:[#allocation5 + $0x70] sm:$0xff]  ;;  %s1333_s26 = sshll.u32 %s363_s17, 4  ;;  %s1334_s26 = int_to_ptr.vmem [resolvable:$true] %s1333_s26 }
  0x2c   : > { %651 = vmatpush.bf16.msra.mxu1 %v1762_v7  ;;  %v383_v21 = vrot.slane %v377_v14, 7  ;;  %v384_v22 = vrot.slane %v378_v15, 7  ;;  %v385_v23 = vrot.slane %v379_v16, 7  ;;  %v392_v25 = vrot.slane %v377_v14, 1  ;;  %697 = vperm.xlu1 %1909, %v382_v33   ;;  %v381_v47 = vld [vmem:[%s2236_s10 + $0x8] sm:$0xff]  ;;  %v1765_v52 = vld [vmem:[#allocation2 + $0x80] sm:$0xff] }
  0x2d   : > { %669 = vmatpush.bf16.msra.mxu2 %v1770_v8  ;;  %v393_v26 = vrot.slane %v378_v15, 1  ;;  %v394_v27 = vrot.slane %v379_v16, 1  ;;  %v1748_v55 = vld [vmem:[%s2222_s23] sm:$0xff]  ;;  %v422_v1 = vpack.c.b16 %v420_v62, %v420_v62  ;;  %v1786_v4 = vld [vmem:[#allocation5 + $0x68] sm:$0xff]  ;;  %v1780_v5 = vld [vmem:[#allocation5 + $0x38] sm:$0xff]  ;;  %s1335_s10 = sshll.u32 %s1332_s25, 4  ;;  %s1336_s10 = int_to_ptr.hbm [resolvable:$true] %s1335_s10 }
  0x2e   : > { %v390_v30 = vsel %vm388_vm0, %v383_v21, %v384_v22  ;;  %v391_v31 = vsel %vm388_vm0, %v385_v23, %v383_v21  ;;  %v389_v57 = vsel %vm388_vm0, %v384_v22, %v385_v23  ;;  %v1796_v6 = vld [vmem:[#allocation5 + $0xb8] sm:$0xff]  ;;  %v1785_v7 = vld [vmem:[#allocation5 + $0x60] sm:$0xff]  ;;  %953 = vmatpush.bf16.msra.mxu3 %v1780_v5  ;;  %v1779_v8 = vld [vmem:[#allocation5 + $0x30] sm:$0xff]  ;;  %s2017_s12 = sshra.s32 %s1336_s10, 4  ;;  %s2018_s12 = int_to_ptr.hbm [resolvable:$true] %s2017_s12 }
  0x2f   : > { %634 = vmatpush.bf16.msra.mxu0 %v1753_v12  ;;  %v396_v35 = vsel %vm395_vm1, %v393_v26, %v394_v27  ;;  %v397_v36 = vsel %vm395_vm1, %v392_v25, %v393_v26  ;;  %v399_v38 = vpack.c.bf16 %v391_v31, %v391_v31  ;;  %v400_v39 = vpack.c.bf16 %v390_v30, %v390_v30  ;;  %v1795_v9 = vld [vmem:[#allocation5 + $0xb0] sm:$0xff]  ;;  %v1784_v10 = vld [vmem:[#allocation5 + $0x58] sm:$0xff]  ;;  %v1778_v11 = vld [vmem:[#allocation5 + $0x28] sm:$0xff]  ;;  %s2019_s13 = scalar_lea.hbm %s2018_s12, 24  ;;  %p2024_p3 = scmp.lt.s32.totalorder %s2018_s12, %s2348_s8 }
  0x30   : > { %652 = vmatpush.bf16.msra.mxu1 %v1761_v13  ;;  %v402_v42 = vpack.c.bf16 %v397_v36, %v397_v36  ;;  %v403_v43 = vpack.c.bf16 %v396_v35, %v396_v35  ;;  %v398_v58 = vsel %vm395_vm1, %v394_v27, %v392_v25  ;;  %v401_v59 = vpack.c.bf16 %v389_v57, %v389_v57  ;;  %v1794_v12 = vld [vmem:[#allocation5 + $0xa8] sm:$0xff]  ;;  %v1783_v13 = vld [vmem:[#allocation5 + $0x50] sm:$0xff]  ;;  %v1777_v14 = vld [vmem:[#allocation5 + $0x20] sm:$0xff]  ;;  %p2020_p0 = scmp.ne.s32.totalorder %s2018_s12, %s2019_s13  ;;  %p2025_p4 = scmp.lt.s32.totalorder %s2023_s21, %s2019_s13 }
  0x31   : > { %670 = vmatpush.bf16.msra.mxu2 %v1769_v17  ;;  %v408_v45 = vunpack.c.l.b16 %v399_v38  ;;  %v409_v46 = vunpack.c.l.b16 %v400_v39  ;;  %v404_v60 = vpack.c.bf16 %v398_v58, %v398_v58  ;;  %v1793_v15 = vld [vmem:[#allocation5 + $0xa0] sm:$0xff]  ;;  %v1782_v16 = vld [vmem:[#allocation5 + $0x48] sm:$0xff]  ;;  %v1776_v17 = vld [vmem:[#allocation5 + $0x18] sm:$0xff] }
  0x32   : > { %v428_v50 = vunpack.c.l.b16 %v402_v42  ;;  %v429_v51 = vunpack.c.l.b16 %v403_v43  ;;  %v410_v61 = vunpack.c.l.b16 %v401_v59  ;;  %954 = vmatpush.bf16.msra.mxu3 %v1779_v8  ;;  %v1775_v21 = vld [vmem:[#allocation5 + $0x10] sm:$0xff]  ;;  %v1910_v23 = vld [vmem:[%s2343_s3] ss:$0 sm:$0xff]  ;;  %v1790_v25 = vld [vmem:[#allocation5 + $0x88] sm:$0xff]  ;;  %p2021_p1 = pnand %p2020_p0, %p2166_p5  ;;  %p2026_p7 = por %p2025_p4, %p2024_p3 }
  0x33   : > { %635 = vmatpush.bf16.msra.mxu0 %v1752_v19  ;;  %692 = vperm.xlu0 %1908, %v381_v47   ;;  %v411_v54 = vpack.c.b16 %v409_v46, %v408_v45  ;;  %v430_v63 = vunpack.c.l.b16 %v404_v60  ;;  %v1792_v19 = vld [vmem:[#allocation5 + $0x98] sm:$0xff]  ;;  %v1791_v22 = vld [vmem:[#allocation5 + $0x90] sm:$0xff] }
  0x34   : > { %653 = vmatpush.bf16.msra.mxu1 %v1760_v20  ;;  %v431_v56 = vpack.c.b16 %v429_v51, %v428_v50  ;;  %v412_v0 = vpack.c.b16 %v410_v61, %v410_v61  ;;  %v1781_v20 = vld [vmem:[#allocation5 + $0x40] sm:$0xff]  ;;  %p2022_p2 = pneg %p2021_p1 }
  0x35   : > { %671 = vmatpush.bf16.msra.mxu2 %v1768_v24  ;;  %v432_v2 = vpack.c.b16 %v430_v63, %v430_v63  ;;  %v1774_v24 = vld [vmem:[#allocation5 + $0x8] sm:$0xff] }
  0x36   : > { %955 = vmatpush.bf16.msra.mxu3 %v1778_v11  ;;  %p2027_p8 = pnand %p2026_p7, %p2022_p2 }
  0x37   : > { %636 = vmatpush.bf16.msra.mxu0 %v1751_v28  ;;  %v1773_v28 = vld [vmem:[#allocation5] sm:$0xff] }
  0x38   : > { %654 = vmatpush.bf16.msra.mxu1 %v1759_v29  ;;  %v1789_v29 = vld [vmem:[#allocation5 + $0x80] sm:$0xff] }
  0x39   : > { %672 = vmatpush.bf16.msra.mxu2 %v1767_v34 }
  0x3a   : > { %956 = vmatpush.bf16.msra.mxu3 %v1777_v14 }
  0x3b   : > { %637 = vmatpush.bf16.msra.mxu0 %v1750_v40 }
  0x3c   : > { %655 = vmatpush.bf16.msra.mxu1 %v1758_v41 }
  0x3d   : > { %673 = vmatpush.bf16.msra.mxu2 %v1766_v44 }
  0x3e   : > { %957 = vmatpush.bf16.msra.mxu3 %v1776_v17 }
  0x3f   : > { %638 = vmatpush.bf16.msra.mxu0 %v1749_v48 }
  0x40   : > { %656 = vmatpush.bf16.msra.mxu1 %v1757_v49 }
  0x41   : > { %674 = vmatpush.bf16.msra.mxu2 %v1765_v52 }
  0x42   : > { %639 = vmatmul.bf16.vlgmr.msra.gmra.mxu0 %v411_v54  ;;  %958 = vmatpush.bf16.msra.mxu3 %v1775_v21 }
  0x43   : > { %971 = vmatpush.bf16.msrb.mxu0 %v1788_v53  ;;  %657 = vmatmul.bf16.vlgmr.msra.gmra.mxu1 %v1748_v55 }
  0x44   : > { %675 = vmatmul.bf16.vlgmr.msra.gmra.mxu2 %v431_v56  ;;  %989 = vmatpush.bf16.msrb.mxu1 %v1796_v6 }
  0x46   : > { %959 = vmatpush.bf16.msra.mxu3 %v1774_v24 }
  0x47   : > { %972 = vmatpush.bf16.msrb.mxu0 %v1787_v3 }
  0x48   : > { %990 = vmatpush.bf16.msrb.mxu1 %v1795_v9 }
  0x4a   : > { %960 = vmatpush.bf16.msra.mxu3 %v1773_v28 }
  0x4b   : > { %973 = vmatpush.bf16.msrb.mxu0 %v1786_v4 }
  0x4c   : > { %991 = vmatpush.bf16.msrb.mxu1 %v1794_v12 }
  0x4f   : > { %974 = vmatpush.bf16.msrb.mxu0 %v1785_v7 }
  0x50   : > { %992 = vmatpush.bf16.msrb.mxu1 %v1793_v15 }
  0x52   : > { %644 = vmatmul.bf16.gmra.mxu0 %v412_v0 }
  0x53   : > { %662 = vmatmul.bf16.gmra.mxu1 %v422_v1  ;;  %975 = vmatpush.bf16.msrb.mxu0 %v1784_v10 }
  0x54   : > { %680 = vmatmul.bf16.gmra.mxu2 %v432_v2  ;;  %993 = vmatpush.bf16.msrb.mxu1 %v1792_v19 }
  0x57   : > { %976 = vmatpush.bf16.msrb.mxu0 %v1783_v13 }
  0x58   : > { %994 = vmatpush.bf16.msrb.mxu1 %v1791_v22 }
  0x5b   : > { %977 = vmatpush.bf16.msrb.mxu0 %v1782_v16 }
  0x5c   : > { %995 = vmatpush.bf16.msrb.mxu1 %v1790_v25 }
  0x5f   : > { %978 = vmatpush.bf16.msrb.mxu0 %v1781_v20 }
  0x60   : > { %996 = vmatpush.bf16.msrb.mxu1 %v1789_v29 }
  0x9d   : > { %v2259_v32 = vpop.permute.xlu0 %687 }
  0x9e   : > { %v2265_v53 = vpop.permute.xlu1 %697 }
  0xa5   : > { %v2262_v42 = vpop.permute.xlu0 %692 }
  0xbf   : > { %v640_v26 = vpop.f32.mrf.mxu0 }
  0xc0   : > { %v658_v27 = vpop.f32.mrf.mxu1  ;;  %v641_v30 = vadd.f32 %v1910_v23, %v640_v26 }
  0xc2   : > { %v659_v31 = vadd.f32 %v658_v27, %v641_v30 }
  0xc7   : > { %v676_v33 = vpop.f32.mrf.mxu2  ;;  %v642_v35 = vpop.f32.mrf.mxu0 }
  0xc8   : > { %v677_v34 = vadd.f32 %v676_v33, %v659_v31  ;;  %v660_v36 = vpop.f32.mrf.mxu1  ;;  %v643_v37 = vadd.f32 %v1910_v23, %v642_v35  ;;  %v1812_v31 = vld [vmem:[#allocation7 + $0x78] sm:$0xff]  ;;  %v1811_v33 = vld [vmem:[#allocation7 + $0x70] sm:$0xff] }
  0xc9   : > { %1278 = vmatpush.bf16.msrb.mxu3 %v1812_v31  ;;  %v1804_v35 = vld [vmem:[#allocation7 + $0x38] sm:$0xff] }
  0xca   : > { %v700_v38 = vmul.f32 %v2259_v32, %v677_v34  ;;  %v661_v39 = vadd.f32 %v660_v36, %v643_v37  ;;  %v1810_v34 = vld [vmem:[#allocation7 + $0x68] sm:$0xff]  ;;  %v1820_v36 = vld [vmem:[#allocation7 + $0xb8] sm:$0xff]  ;;  %v1809_v37 = vld [vmem:[#allocation7 + $0x60] sm:$0xff]  ;;  %1260 = vmatpush.bf16.msrb.mxu2 %v1804_v35 }
  0xcb   : > { %1296 = vmatpush.bf16.msra.mxu0 %v1820_v36  ;;  %1821 = vmatpush.bf16.msra.mxu1 %v1820_v36 }
  0xcc   : > { %v703_v40 = vmax.f32 %v700_v38, 0.0  ;;  %v1803_v38 = vld [vmem:[#allocation7 + $0x30] sm:$0xff] }
  0xcd   : > { %1279 = vmatpush.bf16.msrb.mxu3 %v1811_v33 }
  0xce   : > { %v721_v48 = vpack.c.bf16 %v703_v40, %v703_v40  ;;  %v706_v61 = vrot.slane %v703_v40, 7  ;;  %v712_v62 = vrot.slane %v703_v40, 1  ;;  %v1808_v40 = vld [vmem:[#allocation7 + $0x58] sm:$0xff]  ;;  %1261 = vmatpush.bf16.msrb.mxu2 %v1803_v38 }
  0xcf   : > { %v678_v41 = vpop.f32.mrf.mxu2  ;;  %v645_v44 = vpop.f32.mrf.mxu0 }
  0xd0   : > { %v679_v43 = vadd.f32 %v678_v41, %v661_v39  ;;  %v663_v45 = vpop.f32.mrf.mxu1  ;;  %v646_v46 = vadd.f32 %v1910_v23, %v645_v44  ;;  %v740_v54 = vunpack.c.l.b16 %v721_v48  ;;  %v1819_v39 = vld [vmem:[#allocation7 + $0xb0] sm:$0xff]  ;;  %v1802_v41 = vld [vmem:[#allocation7 + $0x28] sm:$0xff] }
  0xd1   : > { %1280 = vmatpush.bf16.msrb.mxu3 %v1810_v34  ;;  %1297 = vmatpush.bf16.msra.mxu0 %v1819_v39  ;;  %v1807_v44 = vld [vmem:[#allocation7 + $0x50] sm:$0xff]  ;;  %v1806_v48 = vld [vmem:[#allocation7 + $0x48] sm:$0xff] }
  0xd2   : > { %v701_v47 = vmul.f32 %v2262_v42, %v679_v43  ;;  %v664_v50 = vadd.f32 %v663_v45, %v646_v46  ;;  %1822 = vmatpush.bf16.msra.mxu1 %v1819_v39  ;;  %v1818_v43 = vld [vmem:[#allocation7 + $0xa8] sm:$0xff]  ;;  %1262 = vmatpush.bf16.msrb.mxu2 %v1802_v41  ;;  %v1801_v46 = vld [vmem:[#allocation7 + $0x20] sm:$0xff] }
  0xd4   : > { %v704_v49 = vmax.f32 %v701_v47, 0.0  ;;  %v1817_v47 = vld [vmem:[#allocation7 + $0xa0] sm:$0xff] }
  0xd5   : > { %1281 = vmatpush.bf16.msrb.mxu3 %v1809_v37  ;;  %1298 = vmatpush.bf16.msra.mxu0 %v1818_v43 }
  0xd6   : > { %v722_v51 = vpack.c.bf16 %v704_v49, %v704_v49  ;;  %v707_v55 = vrot.slane %v704_v49, 7  ;;  %v713_v56 = vrot.slane %v704_v49, 1  ;;  %1823 = vmatpush.bf16.msra.mxu1 %v1818_v43  ;;  %1263 = vmatpush.bf16.msrb.mxu2 %v1801_v46  ;;  %v1800_v49 = vld [vmem:[#allocation7 + $0x18] sm:$0xff] }
  0xd7   : > { %v681_v52 = vpop.f32.mrf.mxu2  ;;  %v647_v58 = vpop.f32.mrf.mxu0 }
  0xd8   : > { %v682_v57 = vadd.f32 %v681_v52, %v664_v50  ;;  %v665_v59 = vpop.f32.mrf.mxu1  ;;  %v741_v60 = vunpack.c.l.b16 %v722_v51  ;;  %v710_v2 = vsel %vm388_vm0, %v706_v61, %v707_v55  ;;  %v716_v3 = vsel %vm395_vm1, %v712_v62, %v713_v56  ;;  %v1816_v50 = vld [vmem:[#allocation7 + $0x98] sm:$0xff]  ;;  %v1805_v51 = vld [vmem:[#allocation7 + $0x40] sm:$0xff]  ;;  %v1814_v58 = vld [vmem:[#allocation7 + $0x88] sm:$0xff] }
  0xd9   : > { %v719_v7 = vpack.c.bf16 %v710_v2, %v710_v2  ;;  %v724_v8 = vpack.c.bf16 %v716_v3, %v716_v3  ;;  %1282 = vmatpush.bf16.msrb.mxu3 %v1808_v40  ;;  %1299 = vmatpush.bf16.msra.mxu0 %v1817_v47  ;;  %v1911_v59 = vld [vmem:[%s2345_s5] ss:$0 sm:$0xff] }
  0xda   : > { %v702_v63 = vmul.f32 %v2265_v53, %v682_v57  ;;  %v743_v0 = vpack.c.b16 %v741_v60, %v740_v54  ;;  %1824 = vmatpush.bf16.msra.mxu1 %v1817_v47  ;;  %1264 = vmatpush.bf16.msrb.mxu2 %v1800_v49  ;;  %v1799_v54 = vld [vmem:[#allocation7 + $0x10] sm:$0xff]  ;;  %v1798_v57 = vld [vmem:[#allocation7 + $0x8] sm:$0xff]  ;;  %v1797_v60 = vld [vmem:[#allocation7] sm:$0xff] }
  0xdb   : > { %v731_v15 = vunpack.c.l.b16 %v719_v7  ;;  %v750_v16 = vunpack.c.l.b16 %v724_v8 }
  0xdc   : > { %v705_v1 = vmax.f32 %v702_v63, 0.0  ;;  %979 = vmatmul.bf16.vlgmr.msrb.gmra.mxu0 %v743_v0 }
  0xdd   : > { %1283 = vmatpush.bf16.msrb.mxu3 %v1807_v44  ;;  %1300 = vmatpush.bf16.msra.mxu0 %v1816_v50 }
  0xde   : > { %v708_v4 = vrot.slane %v705_v1, 7  ;;  %v714_v5 = vrot.slane %v705_v1, 1  ;;  %v723_v13 = vpack.c.bf16 %v705_v1, %v705_v1  ;;  %1825 = vmatpush.bf16.msra.mxu1 %v1816_v50  ;;  %1265 = vmatpush.bf16.msrb.mxu2 %v1799_v54 }
  0xdf   : > { %v683_v6 = vpop.f32.mrf.mxu2 }
  0xe0   : > { %v711_v9 = vsel %vm388_vm0, %v708_v4, %v706_v61  ;;  %v715_v10 = vsel %vm395_vm1, %v713_v56, %v714_v5  ;;  %v742_v21 = vunpack.c.l.b16 %v723_v13  ;;  %v709_v23 = vsel %vm388_vm0, %v707_v55, %v708_v4  ;;  %v1815_v55 = vld [vmem:[#allocation7 + $0x90] sm:$0xff]  ;;  %v1813_v61 = vld [vmem:[#allocation7 + $0x80] sm:$0xff] }
  0xe1   : > { %v718_v11 = vpack.c.bf16 %v711_v9, %v711_v9  ;;  %v725_v12 = vpack.c.bf16 %v715_v10, %v715_v10  ;;  %v717_v24 = vsel %vm395_vm1, %v714_v5, %v712_v62  ;;  %v720_v25 = vpack.c.bf16 %v709_v23, %v709_v23  ;;  %1284 = vmatpush.bf16.msrb.mxu3 %v1806_v48 }
  0xe2   : > { %v744_v22 = vpack.c.b16 %v742_v21, %v742_v21  ;;  %v726_v26 = vpack.c.bf16 %v717_v24, %v717_v24  ;;  %1301 = vmatpush.bf16.msra.mxu0 %v1815_v55  ;;  %1826 = vmatpush.bf16.msra.mxu1 %v1815_v55 }
  0xe3   : > { %v730_v14 = vunpack.c.l.b16 %v718_v11  ;;  %v751_v17 = vunpack.c.l.b16 %v725_v12  ;;  %v732_v27 = vunpack.c.l.b16 %v720_v25  ;;  %1266 = vmatpush.bf16.msrb.mxu2 %v1798_v57 }
  0xe4   : > { %v752_v28 = vunpack.c.l.b16 %v726_v26 }
  0xe5   : > { %v733_v19 = vpack.c.b16 %v731_v15, %v730_v14  ;;  %v753_v20 = vpack.c.b16 %v751_v17, %v750_v16  ;;  %v734_v29 = vpack.c.b16 %v732_v27, %v732_v27  ;;  %1285 = vmatpush.bf16.msrb.mxu3 %v1805_v51 }
  0xe6   : > { %v754_v30 = vpack.c.b16 %v752_v28, %v752_v28  ;;  %1302 = vmatpush.bf16.msra.mxu0 %v1814_v58  ;;  %1827 = vmatpush.bf16.msra.mxu1 %v1814_v58 }
  0xe7   : > { %961 = vmatmul.bf16.vlgmr.msra.gmra.mxu3 %v733_v19  ;;  %997 = vmatmul.bf16.vlgmr.msrb.gmra.mxu1 %v753_v20 }
  0xe8   : > { %1267 = vmatpush.bf16.msrb.mxu2 %v1797_v60 }
  0xea   : > { %1303 = vmatpush.bf16.msra.mxu0 %v1813_v61  ;;  %1828 = vmatpush.bf16.msra.mxu1 %v1813_v61 }
  0xec   : > { %984 = vmatmul.bf16.gmra.mxu0 %v744_v22 }
  0xf7   : > { %966 = vmatmul.bf16.gmra.mxu3 %v734_v29  ;;  %1002 = vmatmul.bf16.gmra.mxu1 %v754_v30 }
 0x159   : > { %v980_v45 = vpop.f32.mrf.mxu0 }
 0x161   : > { %v982_v52 = vpop.f32.mrf.mxu0 }
 0x164   : > { %v998_v56 = vpop.f32.mrf.mxu1 }
 0x169   : > { %v985_v62 = vpop.f32.mrf.mxu0 }
 0x16a   : > { %v962_v63 = vpop.f32.mrf.mxu3 }
 0x16b   : > { %v963_v0 = vadd.f32 %v1911_v59, %v962_v63 }
 0x16c   : > { %v1000_v1 = vpop.f32.mrf.mxu1 }
 0x16d   : > { %v981_v2 = vadd.f32 %v980_v45, %v963_v0 }
 0x16f   : > { %v999_v3 = vadd.f32 %v998_v56, %v981_v2 }
 0x171   : > { %v987_v4 = vpop.f32.mrf.mxu0  ;;  %v1007_v6 = vmul.f32 %v999_v3, %v2259_v32 }
 0x172   : > { %v964_v5 = vpop.f32.mrf.mxu3 }
 0x173   : > { %v965_v7 = vadd.f32 %v1911_v59, %v964_v5  ;;  %v1010_v10 = vmax.f32 %v1007_v6, 0.0 }
 0x174   : > { %v1003_v8 = vpop.f32.mrf.mxu1 }
 0x175   : > { %v983_v9 = vadd.f32 %v982_v52, %v965_v7  ;;  %v1028_v16 = vpack.c.bf16 %v1010_v10, %v1010_v10  ;;  %v1013_v26 = vrot.slane %v1010_v10, 7  ;;  %v1019_v27 = vrot.slane %v1010_v10, 1 }
 0x177   : > { %v1001_v11 = vadd.f32 %v1000_v1, %v983_v9  ;;  %v1047_v24 = vunpack.c.l.b16 %v1028_v16  ;;  %v1912_v1 = vld [vmem:[%s2347_s7] ss:$0 sm:$0xff] }
 0x179   : > { %v1008_v12 = vmul.f32 %v1001_v11, %v2262_v42 }
 0x17a   : > { %v967_v13 = vpop.f32.mrf.mxu3 }
 0x17b   : > { %v1011_v14 = vmax.f32 %v1008_v12, 0.0  ;;  %v968_v15 = vadd.f32 %v1911_v59, %v967_v13 }
 0x17c   : > { %v1005_v17 = vpop.f32.mrf.mxu1 }
 0x17d   : > { %v986_v19 = vadd.f32 %v985_v62, %v968_v15  ;;  %v1029_v20 = vpack.c.bf16 %v1011_v14, %v1011_v14  ;;  %v1014_v21 = vrot.slane %v1011_v14, 7  ;;  %v1020_v22 = vrot.slane %v1011_v14, 1 }
 0x17f   : > { %v1004_v23 = vadd.f32 %v1003_v8, %v986_v19  ;;  %v1048_v25 = vunpack.c.l.b16 %v1029_v20  ;;  %v1017_v31 = vsel %vm388_vm0, %v1013_v26, %v1014_v21  ;;  %v1023_v34 = vsel %vm395_vm1, %v1019_v27, %v1020_v22 }
 0x180   : > { %v1026_v37 = vpack.c.bf16 %v1017_v31, %v1017_v31  ;;  %v1031_v38 = vpack.c.bf16 %v1023_v34, %v1023_v34 }
 0x181   : > { %v1009_v28 = vmul.f32 %v1004_v23, %v2265_v53  ;;  %v1050_v29 = vpack.c.b16 %v1048_v25, %v1047_v24 }
 0x182   : > { %v969_v30 = vpop.f32.mrf.mxu3  ;;  %v1038_v46 = vunpack.c.l.b16 %v1026_v37  ;;  %v1057_v49 = vunpack.c.l.b16 %v1031_v38 }
 0x183   : > { %v1012_v33 = vmax.f32 %v1009_v28, 0.0  ;;  %1286 = vmatmul.bf16.vlgmr.msrb.gmra.mxu3 %v1050_v29 }
 0x185   : > { %v1021_v35 = vrot.slane %v1012_v33, 1  ;;  %v1015_v36 = vrot.slane %v1012_v33, 7  ;;  %v1030_v47 = vpack.c.bf16 %v1012_v33, %v1012_v33 }
 0x187   : > { %v1018_v39 = vsel %vm388_vm0, %v1015_v36, %v1013_v26  ;;  %v1022_v40 = vsel %vm395_vm1, %v1020_v22, %v1021_v35  ;;  %v1024_v41 = vsel %vm395_vm1, %v1021_v35, %v1019_v27  ;;  %v1049_v56 = vunpack.c.l.b16 %v1030_v47 }
 0x188   : > { %v1025_v43 = vpack.c.bf16 %v1018_v39, %v1018_v39  ;;  %v1032_v44 = vpack.c.bf16 %v1022_v40, %v1022_v40  ;;  %v1033_v45 = vpack.c.bf16 %v1024_v41, %v1024_v41  ;;  %v1016_v58 = vsel %vm388_vm0, %v1014_v21, %v1015_v36 }
 0x189   : > { %v1051_v57 = vpack.c.b16 %v1049_v56, %v1049_v56  ;;  %v1027_v59 = vpack.c.bf16 %v1016_v58, %v1016_v58 }
 0x18a   : > { %v1037_v48 = vunpack.c.l.b16 %v1025_v43  ;;  %v1058_v50 = vunpack.c.l.b16 %v1032_v44  ;;  %v1059_v51 = vunpack.c.l.b16 %v1033_v45 }
 0x18b   : > { %v1039_v60 = vunpack.c.l.b16 %v1027_v59 }
 0x18c   : > { %v1040_v52 = vpack.c.b16 %v1038_v46, %v1037_v48  ;;  %v1060_v54 = vpack.c.b16 %v1058_v50, %v1057_v49  ;;  %v1061_v55 = vpack.c.b16 %v1059_v51, %v1059_v51 }
 0x18d   : > { %v1041_v61 = vpack.c.b16 %v1039_v60, %v1039_v60 }
 0x18e   : > { %1268 = vmatmul.bf16.vlgmr.msrb.gmra.mxu2 %v1040_v52  ;;  %1304 = vmatmul.bf16.vlgmr.msra.gmra.mxu0 %v1060_v54 }
 0x18f   : > { %1309 = vmatmul.bf16.vlgmr.msra.gmra.mxu1 %v1061_v55 }
 0x193   : > { %1291 = vmatmul.bf16.gmra.mxu3 %v1051_v57 }
 0x19e   : > { %1273 = vmatmul.bf16.gmra.mxu2 %v1041_v61 }
 0x206   : > { %v1287_v62 = vpop.f32.mrf.mxu3 }
 0x20b   : > { %v1305_v4 = vpop.f32.mrf.mxu0 }
 0x20c   : > { %v1310_v63 = vpop.f32.mrf.mxu1 }
 0x20e   : > { %v1289_v0 = vpop.f32.mrf.mxu3 }
 0x211   : > { %v1269_v2 = vpop.f32.mrf.mxu2 }
 0x212   : > { %v1270_v3 = vadd.f32 %v1912_v1, %v1269_v2 }
 0x213   : > { %v1307_v12 = vpop.f32.mrf.mxu0 }
 0x214   : > { %v1288_v18 = vadd.f32 %v1287_v62, %v1270_v3  ;;  %v1312_v5 = vpop.f32.mrf.mxu1 }
 0x216   : > { %v1306_v6 = vadd.f32 %v1305_v4, %v1288_v18  ;;  %v1292_v7 = vpop.f32.mrf.mxu3 }
 0x218   : > { %v1314_v8 = vmul.f32 %v1306_v6, %v2259_v32 }
 0x219   : > { %v1271_v9 = vpop.f32.mrf.mxu2 }
 0x21a   : > { %1317 = vst [vmem:[%s363_s17] sm:$0xff] %v1314_v8  ;;  %v1272_v10 = vadd.f32 %v1912_v1, %v1271_v9 }
 0x21c   : > { %v1290_v11 = vadd.f32 %v1289_v0, %v1272_v10 }
 0x21e   : > { %v1308_v13 = vadd.f32 %v1307_v12, %v1290_v11  ;;  %v1294_v14 = vpop.f32.mrf.mxu3 }
 0x220   : > { %v1315_v15 = vmul.f32 %v1308_v13, %v2262_v42 }
 0x221   : > { %v1274_v16 = vpop.f32.mrf.mxu2 }
 0x222   : > { %1318 = vst [vmem:[%s363_s17 + $0x8] sm:$0xff] %v1315_v15  ;;  %v1275_v17 = vadd.f32 %v1912_v1, %v1274_v16 }
 0x224   : > { %v1293_v32 = vadd.f32 %v1292_v7, %v1275_v17 }
 0x226   : > { %v1311_v19 = vadd.f32 %v1310_v63, %v1293_v32 }
 0x228   : > { %v1316_v20 = vmul.f32 %v1311_v19, %v2265_v53 }
 0x229   : > { %v1276_v21 = vpop.f32.mrf.mxu2 }
 0x22a   : > { %1319 = vst [vmem:[%s363_s17 + $0x10] sm:$0xff] %v1316_v20 }
 0x22b   : > { %2030 = shalt.err (!%p2027_p8)
}
 0x22c   : > { %s2081_s2 = smov 128   ;;  %s2082_s17 = smov 8  }
 0x22d   : > { %1845 = dma.vmem_to_hbm [thread:$0]  (%p2166_p5), %s1334_s26, 384, %s1336_s10, %s1321_s9, %s2081_s2, %s2081_s2, %s2082_s17  }
 0x22e PF: > { %p1867_p9 = scmp.ge.s32.totalorder %s2073_s30, 2  ;;  %s1350_s20 = sand.u32 1, %s2061_s27  }
 0x22f   : > { %s1351_s23 = scalar_lea.sflag [#allocation4], %s1350_s20 }
 0x230   : > { %p1858_p10 = pnand %p1867_p9, %p2170_p6 }
 0x232   : > { %p1859_p11 = pneg %p1858_p10 }
 0x234   : > { %2056 = dma.done.wait (%p1859_p11), %s1351_s23, 384  }
 0x235   : > { %2058 = vsyncadd (%p1859_p11), %s1351_s23, 4294966912  ;;  %p20_p12 = scmp.ge.s32.totalorder %s2153_s11, 6   ;;  %s2357_s27 = smov %s2065_s28 }
 0x236   : > { %s2358_s28 = smov %s2069_s29  ;;  %s2359_s29 = smov %s2164_s14 }
 0x237   : > { %s2360_s30 = smov %s2153_s11  ;;  %22 = sbr.rel (!%p20_p12) target bundleno = 8 (0x8), region = 103 }
 0x23c   :  { %1357 = vsyncpa [#allocation3], 1 }
 0x23d   :  { %1359 = vsyncpa [#allocation3 + $0x1], 1 }
 0x23e   :  { %1360 = vsyncpa [#allocation6], 1 }
 0x23f   :  { %1361 = vsyncpa [#allocation4], 1 }
 0x240   :  { %1363 = vsyncpa [#allocation4 + $0x1], 1 }

</bundles_post_ra>
